<compile_context>
chip_gen: v7x
topology: tpu7x:2x2x1
jax: 0.10.0
libtpu: 0.0.40
codegen_flags: <defaults>
</compile_context>

<pallas_src>
import functools

import jax
import jax.numpy as jnp
from jax.experimental import pallas as pl
from jax.experimental.pallas import tpu as pltpu


INPUT_SIZE = 48
HIDDEN_SIZE = 256


def _round_up(n, m):
    return ((n + m - 1) // m) * m


def _use_bf16_elementwise():
    """bf16 element-wise math only on chips with a native bf16 VPU (v6e/v7x)."""
    try:
        kind = jax.devices()[0].device_kind.lower()
    except Exception:
        return False
    return ("v6" in kind) or ("v7" in kind)


def _pick_tile(B, block_b):
    """Pick the batch tile.

    - multiple of 8 sublanes
    - >= 2 grid steps for big batches so the "parallel" axis can shard across
      both v7x TensorCores
    - tile sized from the step count, so padding waste stays < 8 rows/step.
    """
    steps = max(1, -(-B // block_b))
    if steps == 1 and B >= 2048:
        steps = 2                                   # keep both v7x TCs busy
    tb = _round_up(-(-B // steps), 8)
    padded_b = _round_up(B, tb)
    return tb, padded_b


def _fc_discriminator_kernel(x_ref, w_in_ref, b_in_ref,
                             w1_ref, b1_ref, w2_ref, b2_ref,
                             wh_row_ref, bh_ref, out_ref, *, elt_dtype):
    # MXU operands are always bf16 (f32 accumulation inside the MXU).
    # elt_dtype controls the post-matmul element-wise dtype:
    #   bf16 on v6e/v7x (native bf16 VPU), f32 on v5e.
    x = x_ref[...].astype(jnp.bfloat16)

    # input projection + relu
    h = jnp.dot(x, w_in_ref[...], preferred_element_type=elt_dtype)
    h = jnp.maximum(h + b_in_ref[...], 0.0)

    # one residual block with two FC layers (residual kept in elt_dtype, so
    # the bf16 build never materializes an extra f32 copy of h)
    res = h
    t = jnp.dot(h.astype(jnp.bfloat16), w1_ref[...],
                preferred_element_type=elt_dtype)
    t = jnp.maximum(t + b1_ref[...], 0.0)
    t = jnp.dot(t.astype(jnp.bfloat16), w2_ref[...],
                preferred_element_type=elt_dtype) + b2_ref[...]
    h = jnp.maximum(t + res, 0.0)

    # size-1 output head: VPU multiply + lane reduction (keeps the MXU free).
    # The reduction always accumulates in f32.
    y = jnp.sum(h * wh_row_ref[...], axis=-1, keepdims=True,
                dtype=jnp.float32) + bh_ref[...]
    out_ref[...] = y.astype(out_ref.dtype)


def fc_discriminator(x, params, *, block_b=2048):
    """x: (B, INPUT_SIZE) float32. Returns (B, 1) float32."""
    B, D = x.shape
    assert D == INPUT_SIZE, (B, D)

    tb, padded_b = _pick_tile(B, block_b)
    if padded_b != B:
        x = jnp.pad(x, ((0, padded_b - B), (0, 0)))
    grid = (padded_b // tb,)

    elt_dtype = jnp.bfloat16 if _use_bf16_elementwise() else jnp.float32

    # Matmul weights always bf16 (halves resident weight bytes, avoids a
    # per-tile VPU cast).  Biases / head row in the element-wise dtype.
    w_in = params["w_in"].astype(jnp.bfloat16)
    w1 = params["w1"].astype(jnp.bfloat16)
    w2 = params["w2"].astype(jnp.bfloat16)
    b_in = params["b_in"].reshape(1, HIDDEN_SIZE).astype(elt_dtype)
    b1 = params["b1"].reshape(1, HIDDEN_SIZE).astype(elt_dtype)
    b2 = params["b2"].reshape(1, HIDDEN_SIZE).astype(elt_dtype)
    wh_row = params["w_head"].reshape(1, HIDDEN_SIZE).astype(elt_dtype)
    b_head = params["b_head"].reshape(1, 1).astype(jnp.float32)  # f32 head accum

    # Advisory cost hint for the XLA scheduler around the custom call.
    flops = 2 * padded_b * (INPUT_SIZE * HIDDEN_SIZE
                            + 2 * HIDDEN_SIZE * HIDDEN_SIZE
                            + HIDDEN_SIZE)
    bytes_accessed = (padded_b * (INPUT_SIZE + 1) * 4           # x in, y out
                      + (w_in.size + w1.size + w2.size) * 2     # bf16 weights
                      + (4 * HIDDEN_SIZE + 1) * 4)              # biases + head
    cost = pl.CostEstimate(flops=flops, transcendentals=0,
                           bytes_accessed=bytes_accessed)

    kernel = functools.partial(_fc_discriminator_kernel, elt_dtype=elt_dtype)

    def _call(single_buffer_weights):
        def const_spec(shape):
            # Weights/biases: constant index_map -> resident across grid
            # steps.  Buffered(1) drops the never-used second pipeline buffer.
            kw = ({"pipeline_mode": pl.Buffered(1)}
                  if single_buffer_weights else {})
            return pl.BlockSpec(shape, lambda i: (0,) * len(shape), **kw)

        in_specs = [
            pl.BlockSpec((tb, INPUT_SIZE), lambda i: (i, 0)),   # x tile
            const_spec((INPUT_SIZE, HIDDEN_SIZE)),              # w_in
            const_spec((1, HIDDEN_SIZE)),                       # b_in
            const_spec((HIDDEN_SIZE, HIDDEN_SIZE)),             # w1
            const_spec((1, HIDDEN_SIZE)),                       # b1
            const_spec((HIDDEN_SIZE, HIDDEN_SIZE)),             # w2
            const_spec((1, HIDDEN_SIZE)),                       # b2
            const_spec((1, HIDDEN_SIZE)),                       # w_head row
            const_spec((1, 1)),                                 # b_head
        ]

        compiler_kwargs = dict(dimension_semantics=("parallel",))
        if tb > 2048:
            # Bigger tiles exceed the scoped-VMEM default; stay <= 48 MiB so
            # it remains safe on v7x (64 MiB physical VMEM per TensorCore).
            compiler_kwargs["vmem_limit_bytes"] = 48 * 1024 * 1024

        return pl.pallas_call(
            kernel,
            out_shape=jax.ShapeDtypeStruct((padded_b, 1), jnp.float32),
            grid=grid,
            in_specs=in_specs,
            out_specs=pl.BlockSpec((tb, 1), lambda i: (i, 0)),
            compiler_params=pltpu.CompilerParams(**compiler_kwargs),
            cost_estimate=cost,
        )(x, w_in, b_in, w1, b1, w2, b2, wh_row, b_head)

    try:
        out = _call(single_buffer_weights=True)
    except Exception:
        # Fallback for JAX builds that reject pipeline_mode / Buffered(1).
        out = _call(single_buffer_weights=False)

    return out[:B]


def init_params(key):
    """Deterministic parameter init (Kaiming-ish normal scales)."""
    ks = jax.random.split(key, 4)

    def dense(kw, fan_in, fan_out):
        scale = (2.0 / fan_in) ** 0.5
        w = scale * jax.random.normal(kw, (fan_in, fan_out), dtype=jnp.float32)
        b = jnp.zeros((1, fan_out), dtype=jnp.float32)
        return w, b

    w_in, b_in = dense(ks[0], INPUT_SIZE, HIDDEN_SIZE)
    w1, b1 = dense(ks[1], HIDDEN_SIZE, HIDDEN_SIZE)
    w2, b2 = dense(ks[2], HIDDEN_SIZE, HIDDEN_SIZE)
    w_head, b_head = dense(ks[3], HIDDEN_SIZE, 1)
    return {"w_in": w_in, "b_in": b_in,
            "w1": w1, "b1": b1,
            "w2": w2, "b2": b2,
            "w_head": w_head, "b_head": b_head}


def fc_discriminator_ref(x, p):
    """Pure-JAX f32 reference."""
    h = jnp.maximum(x @ p["w_in"] + p["b_in"], 0.0)
    res = h
    t = jnp.maximum(h @ p["w1"] + p["b1"], 0.0)
    t = t @ p["w2"] + p["b2"]
    h = jnp.maximum(t + res, 0.0)
    return h @ p["w_head"] + p["b_head"]


if __name__ == "__main__":
    key = jax.random.PRNGKey(0)
    k_x, k_p = jax.random.split(key)

    B = 8
    x = jax.random.normal(k_x, (B, INPUT_SIZE), dtype=jnp.float32)
    params = init_params(k_p)

    out = fc_discriminator(x, params)
    out = jax.block_until_ready(out)

    ref = fc_discriminator_ref(x, params)
    assert out.shape == (B, 1), out.shape
    # bf16 MXU operands (and, on v6e/v7x, bf16 element-wise activations) with
    # a f32-accumulated head reduction -> loose tolerance vs the f32 reference.
    assert jnp.allclose(out, ref, atol=1e-1, rtol=1e-1), "mismatch vs JAX reference"
    assert bool(jnp.all(jnp.isfinite(out))), "non-finite output"

    print("KERNEL_OK")
</pallas_src>

<mosaic_0001>
module attributes {stable_mosaic.version = 11 : i64} {
  func.func @_fc_discriminator_kernel(%arg0: i32, %arg1: memref<8x48xf32, #tpu.memory_space<vmem>>, %arg2: memref<48x256xbf16, #tpu.memory_space<vmem>>, %arg3: memref<1x256xf32, #tpu.memory_space<vmem>>, %arg4: memref<256x256xbf16, #tpu.memory_space<vmem>>, %arg5: memref<1x256xf32, #tpu.memory_space<vmem>>, %arg6: memref<256x256xbf16, #tpu.memory_space<vmem>>, %arg7: memref<1x256xf32, #tpu.memory_space<vmem>>, %arg8: memref<1x256xf32, #tpu.memory_space<vmem>>, %arg9: memref<1x1xf32, #tpu.memory_space<vmem>>, %arg10: memref<8x1xf32, #tpu.memory_space<vmem>>) attributes {dimension_semantics = [#tpu.dimension_semantics<parallel>], iteration_bounds = array<i64: 1>, scalar_prefetch = 0 : i64, scratch_operands = 0 : i64, tpu.core_type = #tpu.core_type<tc>, window_params = [{transform_indices = @transform_0, window_bounds = array<i64: 8, 48>}, {pipeline_mode = #tpu.pipeline_mode<synchronous>, transform_indices = @transform_1, window_bounds = array<i64: 48, 256>}, {pipeline_mode = #tpu.pipeline_mode<synchronous>, transform_indices = @transform_2, window_bounds = array<i64: 1, 256>}, {pipeline_mode = #tpu.pipeline_mode<synchronous>, transform_indices = @transform_3, window_bounds = array<i64: 256, 256>}, {pipeline_mode = #tpu.pipeline_mode<synchronous>, transform_indices = @transform_4, window_bounds = array<i64: 1, 256>}, {pipeline_mode = #tpu.pipeline_mode<synchronous>, transform_indices = @transform_5, window_bounds = array<i64: 256, 256>}, {pipeline_mode = #tpu.pipeline_mode<synchronous>, transform_indices = @transform_6, window_bounds = array<i64: 1, 256>}, {pipeline_mode = #tpu.pipeline_mode<synchronous>, transform_indices = @transform_7, window_bounds = array<i64: 1, 256>}, {pipeline_mode = #tpu.pipeline_mode<synchronous>, transform_indices = @transform_8, window_bounds = array<i64: 1, 1>}, {transform_indices = @transform_9, window_bounds = array<i64: 8, 1>}]} {
    %c0 = arith.constant 0 : index
    %c0_0 = arith.constant 0 : index
    %0 = vector.load %arg1[%c0, %c0_0] : memref<8x48xf32, #tpu.memory_space<vmem>>, vector<8x48xf32>
    %1 = arith.truncf %0 : vector<8x48xf32> to vector<8x48xbf16>
    %c0_1 = arith.constant 0 : index
    %c0_2 = arith.constant 0 : index
    %2 = vector.load %arg2[%c0_1, %c0_2] : memref<48x256xbf16, #tpu.memory_space<vmem>>, vector<48x256xbf16>
    %cst = arith.constant dense<0.000000e+00> : vector<8x256xf32>
    %3 = tpu.matmul %1, %2, %cst {dimension_numbers = #tpu.dot_dimension_numbers<[1], [0], [0], [1], [0, 0, 1, 1], [], []>} : vector<8x48xbf16>, vector<48x256xbf16>, vector<8x256xf32> -> vector<8x256xf32>
    %c0_3 = arith.constant 0 : index
    %c0_4 = arith.constant 0 : index
    %4 = vector.load %arg3[%c0_3, %c0_4] : memref<1x256xf32, #tpu.memory_space<vmem>>, vector<1x256xf32>
    %5 = vector.broadcast %4 : vector<1x256xf32> to vector<8x256xf32>
    %6 = arith.addf %3, %5 : vector<8x256xf32>
    %cst_5 = arith.constant 0.000000e+00 : f32
    %7 = vector.broadcast %cst_5 : f32 to vector<8x256xf32>
    %8 = arith.maximumf %6, %7 : vector<8x256xf32>
    %9 = arith.truncf %8 : vector<8x256xf32> to vector<8x256xbf16>
    %c0_6 = arith.constant 0 : index
    %c0_7 = arith.constant 0 : index
    %10 = vector.load %arg4[%c0_6, %c0_7] : memref<256x256xbf16, #tpu.memory_space<vmem>>, vector<256x256xbf16>
    %cst_8 = arith.constant dense<0.000000e+00> : vector<8x256xf32>
    %11 = tpu.matmul %9, %10, %cst_8 {dimension_numbers = #tpu.dot_dimension_numbers<[1], [0], [0], [1], [0, 0, 1, 1], [], []>} : vector<8x256xbf16>, vector<256x256xbf16>, vector<8x256xf32> -> vector<8x256xf32>
    %c0_9 = arith.constant 0 : index
    %c0_10 = arith.constant 0 : index
    %12 = vector.load %arg5[%c0_9, %c0_10] : memref<1x256xf32, #tpu.memory_space<vmem>>, vector<1x256xf32>
    %13 = vector.broadcast %12 : vector<1x256xf32> to vector<8x256xf32>
    %14 = arith.addf %11, %13 : vector<8x256xf32>
    %cst_11 = arith.constant 0.000000e+00 : f32
    %15 = vector.broadcast %cst_11 : f32 to vector<8x256xf32>
    %16 = arith.maximumf %14, %15 : vector<8x256xf32>
    %17 = arith.truncf %16 : vector<8x256xf32> to vector<8x256xbf16>
    %c0_12 = arith.constant 0 : index
    %c0_13 = arith.constant 0 : index
    %18 = vector.load %arg6[%c0_12, %c0_13] : memref<256x256xbf16, #tpu.memory_space<vmem>>, vector<256x256xbf16>
    %cst_14 = arith.constant dense<0.000000e+00> : vector<8x256xf32>
    %19 = tpu.matmul %17, %18, %cst_14 {dimension_numbers = #tpu.dot_dimension_numbers<[1], [0], [0], [1], [0, 0, 1, 1], [], []>} : vector<8x256xbf16>, vector<256x256xbf16>, vector<8x256xf32> -> vector<8x256xf32>
    %c0_15 = arith.constant 0 : index
    %c0_16 = arith.constant 0 : index
    %20 = vector.load %arg7[%c0_15, %c0_16] : memref<1x256xf32, #tpu.memory_space<vmem>>, vector<1x256xf32>
    %21 = vector.broadcast %20 : vector<1x256xf32> to vector<8x256xf32>
    %22 = arith.addf %19, %21 : vector<8x256xf32>
    %23 = arith.addf %22, %8 : vector<8x256xf32>
    %cst_17 = arith.constant 0.000000e+00 : f32
    %24 = vector.broadcast %cst_17 : f32 to vector<8x256xf32>
    %25 = arith.maximumf %23, %24 : vector<8x256xf32>
    %c0_18 = arith.constant 0 : index
    %c0_19 = arith.constant 0 : index
    %26 = vector.load %arg8[%c0_18, %c0_19] : memref<1x256xf32, #tpu.memory_space<vmem>>, vector<1x256xf32>
    %27 = vector.broadcast %26 : vector<1x256xf32> to vector<8x256xf32>
    %28 = arith.mulf %25, %27 : vector<8x256xf32>
    %cst_20 = arith.constant dense<0.000000e+00> : vector<8xf32>
    %29 = vector.multi_reduction <add>, %28, %cst_20 [1] : vector<8x256xf32> to vector<8xf32>
    %30 = vector.shape_cast %29 : vector<8xf32> to vector<8x1xf32>
    %c0_21 = arith.constant 0 : index
    %c0_22 = arith.constant 0 : index
    %31 = vector.load %arg9[%c0_21, %c0_22] : memref<1x1xf32, #tpu.memory_space<vmem>>, vector<1x1xf32>
    %32 = vector.broadcast %31 : vector<1x1xf32> to vector<8x1xf32>
    %33 = arith.addf %30, %32 : vector<8x1xf32>
    %c0_23 = arith.constant 0 : index
    %c0_24 = arith.constant 0 : index
    %34 = vector.load %arg10[%c0_23, %c0_24] : memref<8x1xf32, #tpu.memory_space<vmem>>, vector<8x1xf32>
    tpu.vector_store %arg10[%c0_23, %c0_24], %33 {strides = array<i32>} : memref<8x1xf32, #tpu.memory_space<vmem>>, vector<8x1xf32>,
    return
  }
  func.func @transform_0(%arg0: i32) -> (i32, i32) {
    %c0_i32 = arith.constant 0 : i32
    %c0_i32_0 = arith.constant 0 : i32
    return %arg0, %c0_i32 : i32, i32
  }
  func.func @transform_1(%arg0: i32) -> (i32, i32) {
    %c0_i32 = arith.constant 0 : i32
    %c0_i32_0 = arith.constant 0 : i32
    %c0_i32_1 = arith.constant 0 : i32
    return %c0_i32, %c0_i32_0 : i32, i32
  }
  func.func @transform_2(%arg0: i32) -> (i32, i32) {
    %c0_i32 = arith.constant 0 : i32
    %c0_i32_0 = arith.constant 0 : i32
    %c0_i32_1 = arith.constant 0 : i32
    return %c0_i32, %c0_i32_0 : i32, i32
  }
  func.func @transform_3(%arg0: i32) -> (i32, i32) {
    %c0_i32 = arith.constant 0 : i32
    %c0_i32_0 = arith.constant 0 : i32
    %c0_i32_1 = arith.constant 0 : i32
    return %c0_i32, %c0_i32_0 : i32, i32
  }
  func.func @transform_4(%arg0: i32) -> (i32, i32) {
    %c0_i32 = arith.constant 0 : i32
    %c0_i32_0 = arith.constant 0 : i32
    %c0_i32_1 = arith.constant 0 : i32
    return %c0_i32, %c0_i32_0 : i32, i32
  }
  func.func @transform_5(%arg0: i32) -> (i32, i32) {
    %c0_i32 = arith.constant 0 : i32
    %c0_i32_0 = arith.constant 0 : i32
    %c0_i32_1 = arith.constant 0 : i32
    return %c0_i32, %c0_i32_0 : i32, i32
  }
  func.func @transform_6(%arg0: i32) -> (i32, i32) {
    %c0_i32 = arith.constant 0 : i32
    %c0_i32_0 = arith.constant 0 : i32
    %c0_i32_1 = arith.constant 0 : i32
    return %c0_i32, %c0_i32_0 : i32, i32
  }
  func.func @transform_7(%arg0: i32) -> (i32, i32) {
    %c0_i32 = arith.constant 0 : i32
    %c0_i32_0 = arith.constant 0 : i32
    %c0_i32_1 = arith.constant 0 : i32
    return %c0_i32, %c0_i32_0 : i32, i32
  }
  func.func @transform_8(%arg0: i32) -> (i32, i32) {
    %c0_i32 = arith.constant 0 : i32
    %c0_i32_0 = arith.constant 0 : i32
    %c0_i32_1 = arith.constant 0 : i32
    return %c0_i32, %c0_i32_0 : i32, i32
  }
  func.func @transform_9(%arg0: i32) -> (i32, i32) {
    %c0_i32 = arith.constant 0 : i32
    %c0_i32_0 = arith.constant 0 : i32
    return %arg0, %c0_i32 : i32, i32
  }
}

module attributes {stable_mosaic.version = 11 : i64} {
  func.func @_fc_discriminator_kernel(%arg0: i32, %arg1: memref<8x48xf32, #tpu.memory_space<vmem>>, %arg2: memref<48x256xbf16, #tpu.memory_space<vmem>>, %arg3: memref<1x256xf32, #tpu.memory_space<vmem>>, %arg4: memref<256x256xbf16, #tpu.memory_space<vmem>>, %arg5: memref<1x256xf32, #tpu.memory_space<vmem>>, %arg6: memref<256x256xbf16, #tpu.memory_space<vmem>>, %arg7: memref<1x256xf32, #tpu.memory_space<vmem>>, %arg8: memref<1x256xf32, #tpu.memory_space<vmem>>, %arg9: memref<1x1xf32, #tpu.memory_space<vmem>>, %arg10: memref<8x1xf32, #tpu.memory_space<vmem>>) attributes {dimension_semantics = [#tpu.dimension_semantics<parallel>], iteration_bounds = array<i64: 1>, scalar_prefetch = 0 : i64, scratch_operands = 0 : i64, tpu.core_type = #tpu.core_type<tc>, window_params = [{transform_indices = @transform_0, window_bounds = array<i64: 8, 48>}, {pipeline_mode = #tpu.pipeline_mode<synchronous>, transform_indices = @transform_1, window_bounds = array<i64: 48, 256>}, {pipeline_mode = #tpu.pipeline_mode<synchronous>, transform_indices = @transform_2, window_bounds = array<i64: 1, 256>}, {pipeline_mode = #tpu.pipeline_mode<synchronous>, transform_indices = @transform_3, window_bounds = array<i64: 256, 256>}, {pipeline_mode = #tpu.pipeline_mode<synchronous>, transform_indices = @transform_4, window_bounds = array<i64: 1, 256>}, {pipeline_mode = #tpu.pipeline_mode<synchronous>, transform_indices = @transform_5, window_bounds = array<i64: 256, 256>}, {pipeline_mode = #tpu.pipeline_mode<synchronous>, transform_indices = @transform_6, window_bounds = array<i64: 1, 256>}, {pipeline_mode = #tpu.pipeline_mode<synchronous>, transform_indices = @transform_7, window_bounds = array<i64: 1, 256>}, {pipeline_mode = #tpu.pipeline_mode<synchronous>, transform_indices = @transform_8, window_bounds = array<i64: 1, 1>}, {transform_indices = @transform_9, window_bounds = array<i64: 8, 1>}]} {
    %c0 = arith.constant 0 : index
    %c0_0 = arith.constant 0 : index
    %0 = vector.load %arg1[%c0, %c0_0] : memref<8x48xf32, #tpu.memory_space<vmem>>, vector<8x48xf32>
    %1 = arith.truncf %0 : vector<8x48xf32> to vector<8x48xbf16>
    %c0_1 = arith.constant 0 : index
    %c0_2 = arith.constant 0 : index
    %2 = vector.load %arg2[%c0_1, %c0_2] : memref<48x256xbf16, #tpu.memory_space<vmem>>, vector<48x256xbf16>
    %cst = arith.constant dense<0.000000e+00> : vector<8x256xf32>
    %3 = tpu.matmul %1, %2, %cst {dimension_numbers = #tpu.dot_dimension_numbers<[1], [0], [0], [1], [0, 0, 1, 1], [], []>} : vector<8x48xbf16>, vector<48x256xbf16>, vector<8x256xf32> -> vector<8x256xf32>
    %c0_3 = arith.constant 0 : index
    %c0_4 = arith.constant 0 : index
    %4 = vector.load %arg3[%c0_3, %c0_4] : memref<1x256xf32, #tpu.memory_space<vmem>>, vector<1x256xf32>
    %5 = vector.broadcast %4 : vector<1x256xf32> to vector<8x256xf32>
    %6 = arith.addf %3, %5 : vector<8x256xf32>
    %cst_5 = arith.constant 0.000000e+00 : f32
    %7 = vector.broadcast %cst_5 : f32 to vector<8x256xf32>
    %8 = arith.maximumf %6, %7 : vector<8x256xf32>
    %9 = arith.truncf %8 : vector<8x256xf32> to vector<8x256xbf16>
    %c0_6 = arith.constant 0 : index
    %c0_7 = arith.constant 0 : index
    %10 = vector.load %arg4[%c0_6, %c0_7] : memref<256x256xbf16, #tpu.memory_space<vmem>>, vector<256x256xbf16>
    %cst_8 = arith.constant dense<0.000000e+00> : vector<8x256xf32>
    %11 = tpu.matmul %9, %10, %cst_8 {dimension_numbers = #tpu.dot_dimension_numbers<[1], [0], [0], [1], [0, 0, 1, 1], [], []>} : vector<8x256xbf16>, vector<256x256xbf16>, vector<8x256xf32> -> vector<8x256xf32>
    %c0_9 = arith.constant 0 : index
    %c0_10 = arith.constant 0 : index
    %12 = vector.load %arg5[%c0_9, %c0_10] : memref<1x256xf32, #tpu.memory_space<vmem>>, vector<1x256xf32>
    %13 = vector.broadcast %12 : vector<1x256xf32> to vector<8x256xf32>
    %14 = arith.addf %11, %13 : vector<8x256xf32>
    %cst_11 = arith.constant 0.000000e+00 : f32
    %15 = vector.broadcast %cst_11 : f32 to vector<8x256xf32>
    %16 = arith.maximumf %14, %15 : vector<8x256xf32>
    %17 = arith.truncf %16 : vector<8x256xf32> to vector<8x256xbf16>
    %c0_12 = arith.constant 0 : index
    %c0_13 = arith.constant 0 : index
    %18 = vector.load %arg6[%c0_12, %c0_13] : memref<256x256xbf16, #tpu.memory_space<vmem>>, vector<256x256xbf16>
    %cst_14 = arith.constant dense<0.000000e+00> : vector<8x256xf32>
    %19 = tpu.matmul %17, %18, %cst_14 {dimension_numbers = #tpu.dot_dimension_numbers<[1], [0], [0], [1], [0, 0, 1, 1], [], []>} : vector<8x256xbf16>, vector<256x256xbf16>, vector<8x256xf32> -> vector<8x256xf32>
    %c0_15 = arith.constant 0 : index
    %c0_16 = arith.constant 0 : index
    %20 = vector.load %arg7[%c0_15, %c0_16] : memref<1x256xf32, #tpu.memory_space<vmem>>, vector<1x256xf32>
    %21 = vector.broadcast %20 : vector<1x256xf32> to vector<8x256xf32>
    %22 = arith.addf %19, %21 : vector<8x256xf32>
    %23 = arith.addf %22, %8 : vector<8x256xf32>
    %cst_17 = arith.constant 0.000000e+00 : f32
    %24 = vector.broadcast %cst_17 : f32 to vector<8x256xf32>
    %25 = arith.maximumf %23, %24 : vector<8x256xf32>
    %c0_18 = arith.constant 0 : index
    %c0_19 = arith.constant 0 : index
    %26 = vector.load %arg8[%c0_18, %c0_19] : memref<1x256xf32, #tpu.memory_space<vmem>>, vector<1x256xf32>
    %27 = vector.broadcast %26 : vector<1x256xf32> to vector<8x256xf32>
    %28 = arith.mulf %25, %27 : vector<8x256xf32>
    %cst_20 = arith.constant dense<0.000000e+00> : vector<8xf32>
    %29 = vector.multi_reduction <add>, %28, %cst_20 [1] : vector<8x256xf32> to vector<8xf32>
    %30 = vector.shape_cast %29 : vector<8xf32> to vector<8x1xf32>
    %c0_21 = arith.constant 0 : index
    %c0_22 = arith.constant 0 : index
    %31 = vector.load %arg9[%c0_21, %c0_22] : memref<1x1xf32, #tpu.memory_space<vmem>>, vector<1x1xf32>
    %32 = vector.broadcast %31 : vector<1x1xf32> to vector<8x1xf32>
    %33 = arith.addf %30, %32 : vector<8x1xf32>
    %c0_23 = arith.constant 0 : index
    %c0_24 = arith.constant 0 : index
    %34 = vector.load %arg10[%c0_23, %c0_24] : memref<8x1xf32, #tpu.memory_space<vmem>>, vector<8x1xf32>
    tpu.vector_store %arg10[%c0_23, %c0_24], %33 {strides = array<i32>} : memref<8x1xf32, #tpu.memory_space<vmem>>, vector<8x1xf32>,
    return
  }
  func.func @transform_0(%arg0: i32) -> (i32, i32) {
    %c0_i32 = arith.constant 0 : i32
    %c0_i32_0 = arith.constant 0 : i32
    return %arg0, %c0_i32 : i32, i32
  }
  func.func @transform_1(%arg0: i32) -> (i32, i32) {
    %c0_i32 = arith.constant 0 : i32
    %c0_i32_0 = arith.constant 0 : i32
    %c0_i32_1 = arith.constant 0 : i32
    return %c0_i32, %c0_i32_0 : i32, i32
  }
  func.func @transform_2(%arg0: i32) -> (i32, i32) {
    %c0_i32 = arith.constant 0 : i32
    %c0_i32_0 = arith.constant 0 : i32
    %c0_i32_1 = arith.constant 0 : i32
    return %c0_i32, %c0_i32_0 : i32, i32
  }
  func.func @transform_3(%arg0: i32) -> (i32, i32) {
    %c0_i32 = arith.constant 0 : i32
    %c0_i32_0 = arith.constant 0 : i32
    %c0_i32_1 = arith.constant 0 : i32
    return %c0_i32, %c0_i32_0 : i32, i32
  }
  func.func @transform_4(%arg0: i32) -> (i32, i32) {
    %c0_i32 = arith.constant 0 : i32
    %c0_i32_0 = arith.constant 0 : i32
    %c0_i32_1 = arith.constant 0 : i32
    return %c0_i32, %c0_i32_0 : i32, i32
  }
  func.func @transform_5(%arg0: i32) -> (i32, i32) {
    %c0_i32 = arith.constant 0 : i32
    %c0_i32_0 = arith.constant 0 : i32
    %c0_i32_1 = arith.constant 0 : i32
    return %c0_i32, %c0_i32_0 : i32, i32
  }
  func.func @transform_6(%arg0: i32) -> (i32, i32) {
    %c0_i32 = arith.constant 0 : i32
    %c0_i32_0 = arith.constant 0 : i32
    %c0_i32_1 = arith.constant 0 : i32
    return %c0_i32, %c0_i32_0 : i32, i32
  }
  func.func @transform_7(%arg0: i32) -> (i32, i32) {
    %c0_i32 = arith.constant 0 : i32
    %c0_i32_0 = arith.constant 0 : i32
    %c0_i32_1 = arith.constant 0 : i32
    return %c0_i32, %c0_i32_0 : i32, i32
  }
  func.func @transform_8(%arg0: i32) -> (i32, i32) {
    %c0_i32 = arith.constant 0 : i32
    %c0_i32_0 = arith.constant 0 : i32
    %c0_i32_1 = arith.constant 0 : i32
    return %c0_i32, %c0_i32_0 : i32, i32
  }
  func.func @transform_9(%arg0: i32) -> (i32, i32) {
    %c0_i32 = arith.constant 0 : i32
    %c0_i32_0 = arith.constant 0 : i32
    return %arg0, %c0_i32 : i32, i32
  }
}

</mosaic_0001>

<bundles_post_ra>
// kernel: tpu_custom_call.1
= control target key start
LH: loop header
LB: loop body
LE: loop exit
PB: predicated region body
PF: predicated region fallthrough
CT: control target
= control target key end

     0   :  { %s1129_s0 = inlined_call_operand.hbm [shape: f32[8,48], index: 0, kind: input, shape index: {}]   ;;  %s1130_s1 = inlined_call_operand.hbm [shape: bf16[48,256], index: 1, kind: input, shape index: {}]   ;;  %s1131_s2 = inlined_call_operand.vmem [shape: f32[1,256], index: 2, kind: input, shape index: {}]   ;;  %s1132_s3 = inlined_call_operand.hbm [shape: bf16[256,256], index: 3, kind: input, shape index: {}]   ;;  %s1133_s4 = inlined_call_operand.vmem [shape: f32[1,256], index: 4, kind: input, shape index: {}]   ;;  %s1134_s5 = inlined_call_operand.hbm [shape: bf16[256,256], index: 5, kind: input, shape index: {}]   ;;  %s1135_s6 = inlined_call_operand.vmem [shape: f32[1,256], index: 6, kind: input, shape index: {}]   ;;  %s1136_s7 = inlined_call_operand.vmem [shape: f32[1,256], index: 7, kind: input, shape index: {}]   ;;  %s1137_s8 = inlined_call_operand.<no memory space> [shape: f32[1,1], index: 8, kind: input, shape index: {}]   ;;  %s1138_s9 = inlined_call_operand.vmem [shape: f32[8,1], index: 9, kind: output, shape index: {}]  }
   0x1   :  { %v14_v0 = vstv %s1137_s8 }
   0x2   :  { %15 = vst [vmem:[#allocation2] sm:$0x1] %v14_v0 }
   0x3   :  { %16 = vsyncpa [#allocation4], 0 }
   0x4   :  { %17 = vsyncpa [#allocation6], 0 }
   0x5   :  { %18 = vsyncpa [#allocation9], 0  ;;  %s997_s11 = smov [#allocation5]   ;;  %s903_s15 = scalar_lea.hbm %s1130_s1, 768 }
   0x6   :  { %s34_s12 = sshll.u32 %s997_s11, 4  ;;  %p904_p0 = scmp.ne.s32.totalorder %s1130_s1, %s903_s15  ;;  %s35_s12 = int_to_ptr.vmem [resolvable:$true] %s34_s12 }
   0x7   :  { %p907_p1 = scmp.lt.u32.totalorder %s903_s15, %s1130_s1 }
   0x9   :  { %p909_p2 = pnand %p907_p1, %p904_p0 }
   0xb   :  { %912 = shalt.err (!%p909_p2)
}
   0xc   :  { %s913_s8 = scalar_lea.vmem %s35_s12, 768  ;;  %p918_p4 = scmp.lt.s32.totalorder %s35_s12, %s35_s12 }
   0xd   :  { %p914_p3 = scmp.ne.s32.totalorder %s35_s12, %s913_s8  ;;  %p919_p5 = scmp.lt.s32.totalorder %s913_s8, %s913_s8 }
   0xf   :  { %p920_p6 = por %p919_p5, %p918_p4 }
  0x11   :  { %p921_p7 = pnand %p920_p6, %p914_p3 }
  0x13   :  { %924 = shalt.err (!%p921_p7)
}
  0x14   :  { %s998_s20 = smov 128   ;;  %s999_s21 = smov 8  }
  0x15   :  { %40 = dma.hbm_to_vmem [thread:$0]  %s1130_s1, 768, %s35_s12, [#allocation6], %s998_s20, %s998_s20, %s999_s21  }
  0x16   :  { %s1000_s24 = smov [#allocation3]   ;;  %s1001_s26 = smov [#allocation7]  }
  0x17   :  { %s25_s25 = sshll.u32 %s1000_s24, 4  ;;  %s48_s27 = sshll.u32 %s1001_s26, 4  ;;  %s26_s25 = int_to_ptr.vmem [resolvable:$true] %s25_s25  ;;  %s49_s27 = int_to_ptr.vmem [resolvable:$true] %s48_s27 }
  0x18   :  { %s925_s30 = scalar_lea.hbm %s1129_s0, 128 }
  0x19   :  { %p926_p8 = scmp.ne.s32.totalorder %s1129_s0, %s925_s30  ;;  %p929_p9 = scmp.lt.u32.totalorder %s925_s30, %s1129_s0 }
  0x1b   :  { %p931_p10 = pnand %p929_p9, %p926_p8 }
  0x1d   :  { %934 = shalt.err (!%p931_p10)
}
  0x1e   :  { %s935_s1 = scalar_lea.vmem %s26_s25, 128  ;;  %p940_p12 = scmp.lt.s32.totalorder %s26_s25, %s26_s25 }
  0x1f   :  { %p936_p11 = scmp.ne.s32.totalorder %s26_s25, %s935_s1  ;;  %p941_p13 = scmp.lt.s32.totalorder %s935_s1, %s935_s1 }
  0x21   :  { %p942_p0 = por %p941_p13, %p940_p12 }
  0x23   :  { %p943_p1 = pnand %p942_p0, %p936_p11 }
  0x25   :  { %946 = shalt.err (!%p943_p1)
}
  0x26   :  { %28 = dma.hbm_to_vmem [thread:$0]  %s1129_s0, 128, %s26_s25, [#allocation4]  }
  0x27   :  { %s947_s18 = scalar_lea.hbm %s1132_s3, 4096 }
  0x28   :  { %p948_p2 = scmp.ne.s32.totalorder %s1132_s3, %s947_s18  ;;  %p951_p3 = scmp.lt.u32.totalorder %s947_s18, %s1132_s3 }
  0x2a   :  { %p953_p4 = pnand %p951_p3, %p948_p2 }
  0x2c   :  { %956 = shalt.err (!%p953_p4)
}
  0x2d   :  { %s957_s24 = scalar_lea.vmem %s49_s27, 4096  ;;  %p962_p6 = scmp.lt.s32.totalorder %s49_s27, %s49_s27 }
  0x2e   :  { %p958_p5 = scmp.ne.s32.totalorder %s49_s27, %s957_s24  ;;  %p963_p7 = scmp.lt.s32.totalorder %s957_s24, %s957_s24 }
  0x30   :  { %p964_p8 = por %p963_p7, %p962_p6 }
  0x32   :  { %p965_p9 = pnand %p964_p8, %p958_p5 }
  0x34   :  { %968 = shalt.err (!%p965_p9)
}
  0x35   :  { %54 = dma.hbm_to_vmem [thread:$0]  %s1132_s3, 4096, %s49_s27, [#allocation6], %s998_s20, %s998_s20, %s999_s21  }
  0x36   :  { %s1002_s26 = smov [#allocation8]   ;;  %s969_s10 = scalar_lea.hbm %s1134_s5, 4096 }
  0x37   :  { %s62_s28 = sshll.u32 %s1002_s26, 4  ;;  %p970_p10 = scmp.ne.s32.totalorder %s1134_s5, %s969_s10  ;;  %s63_s28 = int_to_ptr.vmem [resolvable:$true] %s62_s28 }
  0x38   :  { %p973_p11 = scmp.lt.u32.totalorder %s969_s10, %s1134_s5 }
  0x3a   :  { %p975_p12 = pnand %p973_p11, %p970_p10 }
  0x3c   :  { %978 = shalt.err (!%p975_p12)
}
  0x3d   :  { %s979_s12 = scalar_lea.vmem %s63_s28, 4096  ;;  %p984_p0 = scmp.lt.s32.totalorder %s63_s28, %s63_s28 }
  0x3e   :  { %p980_p13 = scmp.ne.s32.totalorder %s63_s28, %s979_s12  ;;  %p985_p1 = scmp.lt.s32.totalorder %s979_s12, %s979_s12 }
  0x40   :  { %p986_p2 = por %p985_p1, %p984_p0 }
  0x42   :  { %p987_p3 = pnand %p986_p2, %p980_p13 }
  0x44   :  { %990 = shalt.err (!%p987_p3)
}
  0x45   :  { %68 = dma.hbm_to_vmem [thread:$0]  %s1134_s5, 4096, %s63_s28, [#allocation9], %s998_s20, %s998_s20, %s999_s21  }
  0x46   :  { %991 = dma.done.wait [#allocation4], 128  }
  0x47   :  { %992 = vsyncadd [#allocation4], 4294967168 }
  0x48   :  { %993 = dma.done.wait [#allocation6], 4864  }
  0x49   :  { %994 = vsyncadd [#allocation6], 4294962432 }
  0x4a   :  { %995 = dma.done.wait [#allocation9], 4096  }
  0x4b   :  { %996 = vsyncadd [#allocation9], 4294963200  ;;  %v1003_v1 = vmov 0   ;;  %v798_v2 = vld [vmem:[#allocation5 + $0x4] ss:$8 sps:$4 sm:$0xff]   ;;  %v88_v11 = vld [vmem:[#allocation3] sm:$0xff] }
  0x4c   :  { %174 = vmatprep.mubr.bf16.mxu0 %v1003_v1  ;;  %v800_v3 = vld [vmem:[#allocation5] ss:$8 sps:$4 sm:$0xff]   ;;  %142 = vmatprep.subr.bf16.mxu0 %v798_v2  ;;  %v801_v4 = vld [vmem:[#allocation5 + $0x14] ss:$8 sps:$4 sm:$0xff]   ;;  %v803_v5 = vld [vmem:[#allocation5 + $0x10] ss:$8 sps:$4 sm:$0xff]   ;;  %v89_v14 = vpack.c.bf16 %v88_v11, %v88_v11 }
  0x4d   :  { %143 = vmatpush1.bf16.msra.mxu0 %v800_v3  ;;  %v804_v6 = vld [vmem:[#allocation5 + $0x24] ss:$8 sps:$4 sm:$0xff]   ;;  %v807_v7 = vld [vmem:[#allocation7 + $0x4] ss:$8 sps:$4 sm:$0xff]   ;;  %v809_v8 = vld [vmem:[#allocation7] ss:$8 sps:$4 sm:$0xff]  }
  0x4e   :  { %144 = vmatprep.subr.bf16.mxu0 %v801_v4  ;;  %v806_v9 = vld [vmem:[#allocation5 + $0x20] ss:$8 sps:$4 sm:$0xff]   ;;  %v810_v10 = vld [vmem:[#allocation7 + $0x14] ss:$8 sps:$4 sm:$0xff]   ;;  %391 = vmatprep.subr.bf16.mxu1 %v807_v7  ;;  %v813_v13 = vld [vmem:[#allocation7 + $0x24] ss:$8 sps:$4 sm:$0xff]  }
  0x4f   :  { %392 = vmatpush1.bf16.msra.mxu1 %v809_v8  ;;  %v812_v12 = vld [vmem:[#allocation7 + $0x10] ss:$8 sps:$4 sm:$0xff]   ;;  %vm138_vm0 = vcmask 392192   ;;  %v815_v15 = vld [vmem:[#allocation7 + $0x20] ss:$8 sps:$4 sm:$0xff]   ;;  %vm710_vm1 = vcmask 7168  }
  0x50   :  { %393 = vmatprep.subr.bf16.mxu1 %v810_v10  ;;  %v816_v16 = vld [vmem:[#allocation7 + $0x34] ss:$8 sps:$4 sm:$0xff]   ;;  %v818_v17 = vld [vmem:[#allocation7 + $0x30] ss:$8 sps:$4 sm:$0xff]   ;;  %v819_v18 = vld [vmem:[#allocation7 + $0x44] ss:$8 sps:$4 sm:$0xff]  }
  0x51   :  { %145 = vmatpush1.bf16.msra.mxu0 %v803_v5  ;;  %v821_v19 = vld [vmem:[#allocation7 + $0x40] ss:$8 sps:$4 sm:$0xff]   ;;  %v822_v20 = vld [vmem:[#allocation7 + $0x54] ss:$8 sps:$4 sm:$0xff]   ;;  %v824_v21 = vld [vmem:[#allocation7 + $0x50] ss:$8 sps:$4 sm:$0xff]  }
  0x52   :  { %146 = vmatprep.subr.bf16.mxu0 %v804_v6  ;;  %v825_v22 = vld [vmem:[#allocation7 + $0x64] ss:$8 sps:$4 sm:$0xff]   ;;  %v827_v23 = vld [vmem:[#allocation7 + $0x60] ss:$8 sps:$4 sm:$0xff]   ;;  %v828_v24 = vld [vmem:[#allocation7 + $0x74] ss:$8 sps:$4 sm:$0xff]   ;;  %v98_v6 = vlaneseq }
  0x53   :  { %394 = vmatpush1.bf16.msra.mxu1 %v812_v12  ;;  %v830_v25 = vld [vmem:[#allocation7 + $0x70] ss:$8 sps:$4 sm:$0xff]   ;;  %v831_v26 = vld [vmem:[#allocation7 + $0x84] ss:$8 sps:$4 sm:$0xff]   ;;  %v833_v27 = vld [vmem:[#allocation7 + $0x80] ss:$8 sps:$4 sm:$0xff]  }
  0x54   :  { %395 = vmatprep.subr.bf16.mxu1 %v813_v13  ;;  %v834_v28 = vld [vmem:[#allocation7 + $0x94] ss:$8 sps:$4 sm:$0xff]   ;;  %v836_v29 = vld [vmem:[#allocation7 + $0x90] ss:$8 sps:$4 sm:$0xff]   ;;  %v837_v30 = vld [vmem:[#allocation7 + $0xa4] ss:$8 sps:$4 sm:$0xff]  }
  0x55   :  { %147 = vmatpush1.bf16.msra.mxu0 %v806_v9  ;;  %v839_v31 = vld [vmem:[#allocation7 + $0xa0] ss:$8 sps:$4 sm:$0xff]   ;;  %v840_v32 = vld [vmem:[#allocation7 + $0xb4] ss:$8 sps:$4 sm:$0xff]   ;;  %v842_v33 = vld [vmem:[#allocation7 + $0xb0] ss:$8 sps:$4 sm:$0xff]  }
  0x56   :  { %v843_v34 = vld [vmem:[#allocation7 + $0xc4] ss:$8 sps:$4 sm:$0xff]   ;;  %v845_v35 = vld [vmem:[#allocation7 + $0xc0] ss:$8 sps:$4 sm:$0xff]   ;;  %v846_v36 = vld [vmem:[#allocation7 + $0xd4] ss:$8 sps:$4 sm:$0xff]  }
  0x57   :  { %396 = vmatpush1.bf16.msra.mxu1 %v815_v15  ;;  %v848_v37 = vld [vmem:[#allocation7 + $0xd0] ss:$8 sps:$4 sm:$0xff]   ;;  %v849_v38 = vld [vmem:[#allocation7 + $0xe4] ss:$8 sps:$4 sm:$0xff]   ;;  %v851_v39 = vld [vmem:[#allocation7 + $0xe0] ss:$8 sps:$4 sm:$0xff]  }
  0x58   :  { %725 = vmatmul.mubr.msk.bf16.vlgmr.msra.gmra.mrb[0].mxu0 %vm138_vm0, %v89_v14  ;;  %397 = vmatprep.subr.bf16.mxu1 %v816_v16  ;;  %v852_v40 = vld [vmem:[#allocation7 + $0xf4] ss:$8 sps:$4 sm:$0xff]   ;;  %v854_v41 = vld [vmem:[#allocation7 + $0xf0] ss:$8 sps:$4 sm:$0xff]   ;;  %v855_v42 = vld [vmem:[#allocation8] ss:$8 sps:$4 sm:$0xff]  }
  0x59   :  { %v857_v43 = vld [vmem:[#allocation8 + $0x4] ss:$8 sps:$4 sm:$0xff]   ;;  %v860_v44 = vld [vmem:[#allocation8 + $0x14] ss:$8 sps:$4 sm:$0xff]   ;;  %v858_v45 = vld [vmem:[#allocation8 + $0x10] ss:$8 sps:$4 sm:$0xff]  }
  0x5a   :  { %640 = vmatprep.subr.bf16.mxu0 %v857_v43  ;;  %v863_v46 = vld [vmem:[#allocation8 + $0x24] ss:$8 sps:$4 sm:$0xff]   ;;  %v861_v47 = vld [vmem:[#allocation8 + $0x20] ss:$8 sps:$4 sm:$0xff]   ;;  %v866_v48 = vld [vmem:[#allocation8 + $0x34] ss:$8 sps:$4 sm:$0xff]  }
  0x5b   :  { %398 = vmatpush1.bf16.msra.mxu1 %v818_v17  ;;  %641 = vmatpush1.bf16.msra.mxu0 %v855_v42  ;;  %v864_v49 = vld [vmem:[#allocation8 + $0x30] ss:$8 sps:$4 sm:$0xff]   ;;  %v869_v50 = vld [vmem:[#allocation8 + $0x44] ss:$8 sps:$4 sm:$0xff]   ;;  %v867_v51 = vld [vmem:[#allocation8 + $0x40] ss:$8 sps:$4 sm:$0xff]  }
  0x5c   :  { %399 = vmatprep.subr.bf16.mxu1 %v819_v18  ;;  %642 = vmatprep.subr.bf16.mxu0 %v860_v44  ;;  %v872_v52 = vld [vmem:[#allocation8 + $0x54] ss:$8 sps:$4 sm:$0xff]   ;;  %v870_v53 = vld [vmem:[#allocation8 + $0x50] ss:$8 sps:$4 sm:$0xff]   ;;  %v875_v54 = vld [vmem:[#allocation8 + $0x64] ss:$8 sps:$4 sm:$0xff]  }
  0x5d   :  { %v873_v55 = vld [vmem:[#allocation8 + $0x60] ss:$8 sps:$4 sm:$0xff]   ;;  %v878_v56 = vld [vmem:[#allocation8 + $0x74] ss:$8 sps:$4 sm:$0xff]   ;;  %v876_v57 = vld [vmem:[#allocation8 + $0x70] ss:$8 sps:$4 sm:$0xff]  }
  0x5e   :  { %v881_v58 = vld [vmem:[#allocation8 + $0x84] ss:$8 sps:$4 sm:$0xff]   ;;  %v879_v59 = vld [vmem:[#allocation8 + $0x80] ss:$8 sps:$4 sm:$0xff]   ;;  %v884_v60 = vld [vmem:[#allocation8 + $0x94] ss:$8 sps:$4 sm:$0xff]  }
  0x5f   :  { %400 = vmatpush1.bf16.msra.mxu1 %v821_v19  ;;  %643 = vmatpush1.bf16.msra.mxu0 %v858_v45  ;;  %v882_v61 = vld [vmem:[#allocation8 + $0x90] ss:$8 sps:$4 sm:$0xff]   ;;  %v887_v62 = vld [vmem:[#allocation8 + $0xa4] ss:$8 sps:$4 sm:$0xff]   ;;  %v885_v63 = vld [vmem:[#allocation8 + $0xa0] ss:$8 sps:$4 sm:$0xff]  }
  0x60   :  { %401 = vmatprep.subr.bf16.mxu1 %v822_v20  ;;  %644 = vmatprep.subr.bf16.mxu0 %v863_v46  ;;  %v890_v0 = vld [vmem:[#allocation8 + $0xb4] ss:$8 sps:$4 sm:$0xff]   ;;  %v888_v1 = vld [vmem:[#allocation8 + $0xb0] ss:$8 sps:$4 sm:$0xff]   ;;  %v893_v2 = vld [vmem:[#allocation8 + $0xc4] ss:$8 sps:$4 sm:$0xff]  }
  0x61   :  { %v891_v3 = vld [vmem:[#allocation8 + $0xc0] ss:$8 sps:$4 sm:$0xff]   ;;  %v896_v4 = vld [vmem:[#allocation8 + $0xd4] ss:$8 sps:$4 sm:$0xff]   ;;  %v894_v5 = vld [vmem:[#allocation8 + $0xd0] ss:$8 sps:$4 sm:$0xff]  }
  0x62   :  { %v99_v7 = vshrl.u32 %v98_v6, 7  ;;  %v96_v9 = vld [vmem:[%s1131_s2] sm:$0x3] }
  0x63   :  { %402 = vmatpush1.bf16.msra.mxu1 %v824_v21  ;;  %645 = vmatpush1.bf16.msra.mxu0 %v861_v47  ;;  %v685_v44 = vld [vmem:[%s1136_s7] sm:$0x3] }
  0x64   :  { %403 = vmatprep.subr.bf16.mxu1 %v825_v22  ;;  %646 = vmatprep.subr.bf16.mxu0 %v866_v48  ;;  %v100_v8 = vsub.s32 0, %v99_v7  ;;  %v104_v10 = vsub.s32 1, %v99_v7 }
  0x66   :  { %v101_v11 = vrot.slane %v96_v9, %v100_v8  ;;  %v105_v12 = vrot.slane %v96_v9, %v104_v10 }
  0x67   :  { %404 = vmatpush1.bf16.msra.mxu1 %v827_v23  ;;  %647 = vmatpush1.bf16.msra.mxu0 %v864_v49  ;;  %v899_v23 = vld [vmem:[#allocation8 + $0xe4] ss:$8 sps:$4 sm:$0xff]  }
  0x68   :  { %405 = vmatprep.subr.bf16.mxu1 %v828_v24  ;;  %648 = vmatprep.subr.bf16.mxu0 %v869_v50  ;;  %v897_v24 = vld [vmem:[#allocation8 + $0xe0] ss:$8 sps:$4 sm:$0xff]  }
  0x6b   :  { %406 = vmatpush1.bf16.msra.mxu1 %v830_v25  ;;  %649 = vmatpush1.bf16.msra.mxu0 %v867_v51  ;;  %v902_v25 = vld [vmem:[#allocation8 + $0xf4] ss:$8 sps:$4 sm:$0xff]   ;;  %v690_v51 = vrot.slane %v685_v44, %v100_v8 }
  0x6c   :  { %407 = vmatprep.subr.bf16.mxu1 %v831_v26  ;;  %650 = vmatprep.subr.bf16.mxu0 %v872_v52  ;;  %v900_v26 = vld [vmem:[#allocation8 + $0xf0] ss:$8 sps:$4 sm:$0xff]  }
  0x6f   :  { %408 = vmatpush1.bf16.msra.mxu1 %v833_v27  ;;  %651 = vmatpush1.bf16.msra.mxu0 %v870_v53  ;;  %v219_v27 = vld [vmem:[%s1133_s4] sm:$0x3]  ;;  %v694_v53 = vrot.slane %v685_v44, %v104_v10 }
  0x70   :  { %409 = vmatprep.subr.bf16.mxu1 %v834_v28  ;;  %652 = vmatprep.subr.bf16.mxu0 %v875_v54  ;;  %v224_v28 = vrot.slane %v219_v27, %v100_v8 }
  0x73   :  { %410 = vmatpush1.bf16.msra.mxu1 %v836_v29  ;;  %653 = vmatpush1.bf16.msra.mxu0 %v873_v55  ;;  %v228_v29 = vrot.slane %v219_v27, %v104_v10 }
  0x74   :  { %411 = vmatprep.subr.bf16.mxu1 %v837_v30  ;;  %654 = vmatprep.subr.bf16.mxu0 %v878_v56 }
  0x77   :  { %412 = vmatpush1.bf16.msra.mxu1 %v839_v31  ;;  %655 = vmatpush1.bf16.msra.mxu0 %v876_v57 }
  0x78   :  { %413 = vmatprep.subr.bf16.mxu1 %v840_v32  ;;  %656 = vmatprep.subr.bf16.mxu0 %v881_v58 }
  0x7b   :  { %414 = vmatpush1.bf16.msra.mxu1 %v842_v33  ;;  %657 = vmatpush1.bf16.msra.mxu0 %v879_v59  ;;  %v790_v59 = vld [vmem:[#allocation2] ss:$0 sm:$0xff] }
  0x7c   :  { %415 = vmatprep.subr.bf16.mxu1 %v843_v34  ;;  %658 = vmatprep.subr.bf16.mxu0 %v884_v60 }
  0x7f   :  { %416 = vmatpush1.bf16.msra.mxu1 %v845_v35  ;;  %659 = vmatpush1.bf16.msra.mxu0 %v882_v61 }
  0x80   :  { %417 = vmatprep.subr.bf16.mxu1 %v846_v36  ;;  %660 = vmatprep.subr.bf16.mxu0 %v887_v62 }
  0x83   :  { %418 = vmatpush1.bf16.msra.mxu1 %v848_v37  ;;  %661 = vmatpush1.bf16.msra.mxu0 %v885_v63 }
  0x84   :  { %419 = vmatprep.subr.bf16.mxu1 %v849_v38  ;;  %662 = vmatprep.subr.bf16.mxu0 %v890_v0 }
  0x87   :  { %420 = vmatpush1.bf16.msra.mxu1 %v851_v39  ;;  %663 = vmatpush1.bf16.msra.mxu0 %v888_v1 }
  0x88   :  { %421 = vmatprep.subr.bf16.mxu1 %v852_v40  ;;  %664 = vmatprep.subr.bf16.mxu0 %v893_v2  ;;  %v468_v40 = vld [vmem:[%s1135_s6] sm:$0x3] }
  0x89   :  { %v477_v42 = vrot.slane %v468_v40, %v104_v10 }
  0x8b   :  { %422 = vmatpush1.bf16.msra.mxu1 %v854_v41  ;;  %665 = vmatpush1.bf16.msra.mxu0 %v891_v3  ;;  %v473_v41 = vrot.slane %v468_v40, %v100_v8 }
  0x8c   :  { %666 = vmatprep.subr.bf16.mxu0 %v896_v4 }
  0x8f   :  { %667 = vmatpush1.bf16.msra.mxu0 %v894_v5 }
  0x90   :  { %668 = vmatprep.subr.bf16.mxu0 %v899_v23 }
  0x93   :  { %669 = vmatpush1.bf16.msra.mxu0 %v897_v24 }
  0x94   :  { %670 = vmatprep.subr.bf16.mxu0 %v902_v25 }
  0x97   :  { %671 = vmatpush1.bf16.msra.mxu0 %v900_v26 }
 0x12b   :  { %v176_v13 = vpop.f32.mrb[0].mxu0 }
 0x12c   :  { %v177_v14 = vadd.f32 %v176_v13, %v101_v11  ;;  %v178_v15 = vpop.f32.mrb[1].mxu0 }
 0x12d   :  { %v179_v16 = vadd.f32 %v178_v15, %v105_v12  ;;  %v180_v17 = vpop.f32.mrb[2].mxu0 }
 0x12e   :  { %v183_v18 = vmax.f32 %v177_v14, 0.0  ;;  %v181_v19 = vpop.f32.mrb[3].mxu0 }
 0x12f   :  { %v184_v20 = vmax.f32 %v179_v16, 0.0 }
 0x130   :  { %v185_v22 = vpack.c.bf16 %v183_v18, %v183_v18 }
 0x131   :  { %v186_v21 = vpack.c.bf16 %v184_v20, %v184_v20 }
 0x133   :  { %423 = vmatprep.mubr.bf16.mxu1 %v186_v21 }
 0x134   :  { %424 = vmatmul.mubr.bf16.vlgmr.msra.gmra.mrb[0].mxu1 %v185_v22 }
 0x207   :  { %v425_v30 = vpop.f32.mrb[0].mxu1 }
 0x208   :  { %v426_v31 = vadd.f32 %v425_v30, %v224_v28  ;;  %v427_v32 = vpop.f32.mrb[1].mxu1 }
 0x209   :  { %v428_v33 = vadd.f32 %v427_v32, %v228_v29  ;;  %v429_v34 = vpop.f32.mrb[2].mxu1 }
 0x20a   :  { %v432_v35 = vmax.f32 %v426_v31, 0.0  ;;  %v430_v36 = vpop.f32.mrb[3].mxu1 }
 0x20b   :  { %v433_v37 = vmax.f32 %v428_v33, 0.0 }
 0x20c   :  { %v434_v39 = vpack.c.bf16 %v432_v35, %v432_v35 }
 0x20d   :  { %v435_v38 = vpack.c.bf16 %v433_v37, %v433_v37 }
 0x20f   :  { %672 = vmatprep.mubr.bf16.mxu0 %v435_v38 }
 0x210   :  { %673 = vmatmul.mubr.bf16.vlgmr.msra.gmra.mrb[4].mxu0 %v434_v39 }
 0x2e3   :  { %v674_v43 = vpop.f32.mrb[4].mxu0 }
 0x2e4   :  { %v675_v45 = vadd.f32 %v674_v43, %v473_v41  ;;  %v676_v46 = vpop.f32.mrb[5].mxu0 }
 0x2e5   :  { %v677_v47 = vadd.f32 %v676_v46, %v477_v42  ;;  %v678_v48 = vpop.f32.mrb[6].mxu0 }
 0x2e6   :  { %v681_v49 = vadd.f32 %v675_v45, %v183_v18  ;;  %v679_v50 = vpop.f32.mrb[7].mxu0 }
 0x2e7   :  { %v682_v52 = vadd.f32 %v677_v47, %v184_v20 }
 0x2e8   :  { %v683_v54 = vmax.f32 %v681_v49, 0.0 }
 0x2e9   :  { %v684_v55 = vmax.f32 %v682_v52, 0.0 }
 0x2ea   :  { %v697_v56 = vmul.f32 %v690_v51, %v683_v54 }
 0x2eb   :  { %v698_v57 = vmul.f32 %v694_v53, %v684_v55 }
 0x2ed   :  { %v699_v58 = vadd.f32 %v698_v57, %v697_v56 }
 0x2ef   :  { %700 = vadd.xlane.f32.xlu0 %v699_v58 }
 0x37c   :  { %v701_v60 = vpop.xlane.xlu0 %700 }
 0x37d   :  { %v709_v61 = vadd.f32 %v790_v59, %v701_v60 }
 0x37f   :  { %711 = vst.msk [vmem:[%s1138_s9] sm:$0xff] %vm710_vm1, %v709_v61 }
 0x380   :  { %716 = vsyncpa [#allocation4], 1 }
 0x381   :  { %717 = vsyncpa [#allocation6], 1 }
 0x382   :  { %718 = vsyncpa [#allocation9], 1 }

// kernel: tpu_custom_call.1
= control target key start
LH: loop header
LB: loop body
LE: loop exit
PB: predicated region body
PF: predicated region fallthrough
CT: control target
= control target key end

     0   :  { %s1129_s0 = inlined_call_operand.hbm [shape: f32[8,48], index: 0, kind: input, shape index: {}]   ;;  %s1130_s1 = inlined_call_operand.hbm [shape: bf16[48,256], index: 1, kind: input, shape index: {}]   ;;  %s1131_s2 = inlined_call_operand.vmem [shape: f32[1,256], index: 2, kind: input, shape index: {}]   ;;  %s1132_s3 = inlined_call_operand.hbm [shape: bf16[256,256], index: 3, kind: input, shape index: {}]   ;;  %s1133_s4 = inlined_call_operand.vmem [shape: f32[1,256], index: 4, kind: input, shape index: {}]   ;;  %s1134_s5 = inlined_call_operand.hbm [shape: bf16[256,256], index: 5, kind: input, shape index: {}]   ;;  %s1135_s6 = inlined_call_operand.vmem [shape: f32[1,256], index: 6, kind: input, shape index: {}]   ;;  %s1136_s7 = inlined_call_operand.vmem [shape: f32[1,256], index: 7, kind: input, shape index: {}]   ;;  %s1137_s8 = inlined_call_operand.<no memory space> [shape: f32[1,1], index: 8, kind: input, shape index: {}]   ;;  %s1138_s9 = inlined_call_operand.vmem [shape: f32[8,1], index: 9, kind: output, shape index: {}]  }
   0x1   :  { %v14_v0 = vstv %s1137_s8 }
   0x2   :  { %15 = vst [vmem:[#allocation2] sm:$0x1] %v14_v0 }
   0x3   :  { %16 = vsyncpa [#allocation4], 0 }
   0x4   :  { %17 = vsyncpa [#allocation6], 0 }
   0x5   :  { %18 = vsyncpa [#allocation9], 0  ;;  %s997_s11 = smov [#allocation5]   ;;  %s903_s15 = scalar_lea.hbm %s1130_s1, 768 }
   0x6   :  { %s34_s12 = sshll.u32 %s997_s11, 4  ;;  %p904_p0 = scmp.ne.s32.totalorder %s1130_s1, %s903_s15  ;;  %s35_s12 = int_to_ptr.vmem [resolvable:$true] %s34_s12 }
   0x7   :  { %p907_p1 = scmp.lt.u32.totalorder %s903_s15, %s1130_s1 }
   0x9   :  { %p909_p2 = pnand %p907_p1, %p904_p0 }
   0xb   :  { %912 = shalt.err (!%p909_p2)
}
   0xc   :  { %s913_s8 = scalar_lea.vmem %s35_s12, 768  ;;  %p918_p4 = scmp.lt.s32.totalorder %s35_s12, %s35_s12 }
   0xd   :  { %p914_p3 = scmp.ne.s32.totalorder %s35_s12, %s913_s8  ;;  %p919_p5 = scmp.lt.s32.totalorder %s913_s8, %s913_s8 }
   0xf   :  { %p920_p6 = por %p919_p5, %p918_p4 }
  0x11   :  { %p921_p7 = pnand %p920_p6, %p914_p3 }
  0x13   :  { %924 = shalt.err (!%p921_p7)
}
  0x14   :  { %s998_s20 = smov 128   ;;  %s999_s21 = smov 8  }
  0x15   :  { %40 = dma.hbm_to_vmem [thread:$0]  %s1130_s1, 768, %s35_s12, [#allocation6], %s998_s20, %s998_s20, %s999_s21  }
  0x16   :  { %s1000_s24 = smov [#allocation3]   ;;  %s1001_s26 = smov [#allocation7]  }
  0x17   :  { %s25_s25 = sshll.u32 %s1000_s24, 4  ;;  %s48_s27 = sshll.u32 %s1001_s26, 4  ;;  %s26_s25 = int_to_ptr.vmem [resolvable:$true] %s25_s25  ;;  %s49_s27 = int_to_ptr.vmem [resolvable:$true] %s48_s27 }
  0x18   :  { %s925_s30 = scalar_lea.hbm %s1129_s0, 128 }
  0x19   :  { %p926_p8 = scmp.ne.s32.totalorder %s1129_s0, %s925_s30  ;;  %p929_p9 = scmp.lt.u32.totalorder %s925_s30, %s1129_s0 }
  0x1b   :  { %p931_p10 = pnand %p929_p9, %p926_p8 }
  0x1d   :  { %934 = shalt.err (!%p931_p10)
}
  0x1e   :  { %s935_s1 = scalar_lea.vmem %s26_s25, 128  ;;  %p940_p12 = scmp.lt.s32.totalorder %s26_s25, %s26_s25 }
  0x1f   :  { %p936_p11 = scmp.ne.s32.totalorder %s26_s25, %s935_s1  ;;  %p941_p13 = scmp.lt.s32.totalorder %s935_s1, %s935_s1 }
  0x21   :  { %p942_p0 = por %p941_p13, %p940_p12 }
  0x23   :  { %p943_p1 = pnand %p942_p0, %p936_p11 }
  0x25   :  { %946 = shalt.err (!%p943_p1)
}
  0x26   :  { %28 = dma.hbm_to_vmem [thread:$0]  %s1129_s0, 128, %s26_s25, [#allocation4]  }
  0x27   :  { %s947_s18 = scalar_lea.hbm %s1132_s3, 4096 }
  0x28   :  { %p948_p2 = scmp.ne.s32.totalorder %s1132_s3, %s947_s18  ;;  %p951_p3 = scmp.lt.u32.totalorder %s947_s18, %s1132_s3 }
  0x2a   :  { %p953_p4 = pnand %p951_p3, %p948_p2 }
  0x2c   :  { %956 = shalt.err (!%p953_p4)
}
  0x2d   :  { %s957_s24 = scalar_lea.vmem %s49_s27, 4096  ;;  %p962_p6 = scmp.lt.s32.totalorder %s49_s27, %s49_s27 }
  0x2e   :  { %p958_p5 = scmp.ne.s32.totalorder %s49_s27, %s957_s24  ;;  %p963_p7 = scmp.lt.s32.totalorder %s957_s24, %s957_s24 }
  0x30   :  { %p964_p8 = por %p963_p7, %p962_p6 }
  0x32   :  { %p965_p9 = pnand %p964_p8, %p958_p5 }
  0x34   :  { %968 = shalt.err (!%p965_p9)
}
  0x35   :  { %54 = dma.hbm_to_vmem [thread:$0]  %s1132_s3, 4096, %s49_s27, [#allocation6], %s998_s20, %s998_s20, %s999_s21  }
  0x36   :  { %s1002_s26 = smov [#allocation8]   ;;  %s969_s10 = scalar_lea.hbm %s1134_s5, 4096 }
  0x37   :  { %s62_s28 = sshll.u32 %s1002_s26, 4  ;;  %p970_p10 = scmp.ne.s32.totalorder %s1134_s5, %s969_s10  ;;  %s63_s28 = int_to_ptr.vmem [resolvable:$true] %s62_s28 }
  0x38   :  { %p973_p11 = scmp.lt.u32.totalorder %s969_s10, %s1134_s5 }
  0x3a   :  { %p975_p12 = pnand %p973_p11, %p970_p10 }
  0x3c   :  { %978 = shalt.err (!%p975_p12)
}
  0x3d   :  { %s979_s12 = scalar_lea.vmem %s63_s28, 4096  ;;  %p984_p0 = scmp.lt.s32.totalorder %s63_s28, %s63_s28 }
  0x3e   :  { %p980_p13 = scmp.ne.s32.totalorder %s63_s28, %s979_s12  ;;  %p985_p1 = scmp.lt.s32.totalorder %s979_s12, %s979_s12 }
  0x40   :  { %p986_p2 = por %p985_p1, %p984_p0 }
  0x42   :  { %p987_p3 = pnand %p986_p2, %p980_p13 }
  0x44   :  { %990 = shalt.err (!%p987_p3)
}
  0x45   :  { %68 = dma.hbm_to_vmem [thread:$0]  %s1134_s5, 4096, %s63_s28, [#allocation9], %s998_s20, %s998_s20, %s999_s21  }
  0x46   :  { %991 = dma.done.wait [#allocation4], 128  }
  0x47   :  { %992 = vsyncadd [#allocation4], 4294967168 }
  0x48   :  { %993 = dma.done.wait [#allocation6], 4864  }
  0x49   :  { %994 = vsyncadd [#allocation6], 4294962432 }
  0x4a   :  { %995 = dma.done.wait [#allocation9], 4096  }
  0x4b   :  { %996 = vsyncadd [#allocation9], 4294963200  ;;  %v1003_v1 = vmov 0   ;;  %v798_v2 = vld [vmem:[#allocation5 + $0x4] ss:$8 sps:$4 sm:$0xff]   ;;  %v88_v11 = vld [vmem:[#allocation3] sm:$0xff] }
  0x4c   :  { %174 = vmatprep.mubr.bf16.mxu0 %v1003_v1  ;;  %v800_v3 = vld [vmem:[#allocation5] ss:$8 sps:$4 sm:$0xff]   ;;  %142 = vmatprep.subr.bf16.mxu0 %v798_v2  ;;  %v801_v4 = vld [vmem:[#allocation5 + $0x14] ss:$8 sps:$4 sm:$0xff]   ;;  %v803_v5 = vld [vmem:[#allocation5 + $0x10] ss:$8 sps:$4 sm:$0xff]   ;;  %v89_v14 = vpack.c.bf16 %v88_v11, %v88_v11 }
  0x4d   :  { %143 = vmatpush1.bf16.msra.mxu0 %v800_v3  ;;  %v804_v6 = vld [vmem:[#allocation5 + $0x24] ss:$8 sps:$4 sm:$0xff]   ;;  %v807_v7 = vld [vmem:[#allocation7 + $0x4] ss:$8 sps:$4 sm:$0xff]   ;;  %v809_v8 = vld [vmem:[#allocation7] ss:$8 sps:$4 sm:$0xff]  }
  0x4e   :  { %144 = vmatprep.subr.bf16.mxu0 %v801_v4  ;;  %v806_v9 = vld [vmem:[#allocation5 + $0x20] ss:$8 sps:$4 sm:$0xff]   ;;  %v810_v10 = vld [vmem:[#allocation7 + $0x14] ss:$8 sps:$4 sm:$0xff]   ;;  %391 = vmatprep.subr.bf16.mxu1 %v807_v7  ;;  %v813_v13 = vld [vmem:[#allocation7 + $0x24] ss:$8 sps:$4 sm:$0xff]  }
  0x4f   :  { %392 = vmatpush1.bf16.msra.mxu1 %v809_v8  ;;  %v812_v12 = vld [vmem:[#allocation7 + $0x10] ss:$8 sps:$4 sm:$0xff]   ;;  %vm138_vm0 = vcmask 392192   ;;  %v815_v15 = vld [vmem:[#allocation7 + $0x20] ss:$8 sps:$4 sm:$0xff]   ;;  %vm710_vm1 = vcmask 7168  }
  0x50   :  { %393 = vmatprep.subr.bf16.mxu1 %v810_v10  ;;  %v816_v16 = vld [vmem:[#allocation7 + $0x34] ss:$8 sps:$4 sm:$0xff]   ;;  %v818_v17 = vld [vmem:[#allocation7 + $0x30] ss:$8 sps:$4 sm:$0xff]   ;;  %v819_v18 = vld [vmem:[#allocation7 + $0x44] ss:$8 sps:$4 sm:$0xff]  }
  0x51   :  { %145 = vmatpush1.bf16.msra.mxu0 %v803_v5  ;;  %v821_v19 = vld [vmem:[#allocation7 + $0x40] ss:$8 sps:$4 sm:$0xff]   ;;  %v822_v20 = vld [vmem:[#allocation7 + $0x54] ss:$8 sps:$4 sm:$0xff]   ;;  %v824_v21 = vld [vmem:[#allocation7 + $0x50] ss:$8 sps:$4 sm:$0xff]  }
  0x52   :  { %146 = vmatprep.subr.bf16.mxu0 %v804_v6  ;;  %v825_v22 = vld [vmem:[#allocation7 + $0x64] ss:$8 sps:$4 sm:$0xff]   ;;  %v827_v23 = vld [vmem:[#allocation7 + $0x60] ss:$8 sps:$4 sm:$0xff]   ;;  %v828_v24 = vld [vmem:[#allocation7 + $0x74] ss:$8 sps:$4 sm:$0xff]   ;;  %v98_v6 = vlaneseq }
  0x53   :  { %394 = vmatpush1.bf16.msra.mxu1 %v812_v12  ;;  %v830_v25 = vld [vmem:[#allocation7 + $0x70] ss:$8 sps:$4 sm:$0xff]   ;;  %v831_v26 = vld [vmem:[#allocation7 + $0x84] ss:$8 sps:$4 sm:$0xff]   ;;  %v833_v27 = vld [vmem:[#allocation7 + $0x80] ss:$8 sps:$4 sm:$0xff]  }
  0x54   :  { %395 = vmatprep.subr.bf16.mxu1 %v813_v13  ;;  %v834_v28 = vld [vmem:[#allocation7 + $0x94] ss:$8 sps:$4 sm:$0xff]   ;;  %v836_v29 = vld [vmem:[#allocation7 + $0x90] ss:$8 sps:$4 sm:$0xff]   ;;  %v837_v30 = vld [vmem:[#allocation7 + $0xa4] ss:$8 sps:$4 sm:$0xff]  }
  0x55   :  { %147 = vmatpush1.bf16.msra.mxu0 %v806_v9  ;;  %v839_v31 = vld [vmem:[#allocation7 + $0xa0] ss:$8 sps:$4 sm:$0xff]   ;;  %v840_v32 = vld [vmem:[#allocation7 + $0xb4] ss:$8 sps:$4 sm:$0xff]   ;;  %v842_v33 = vld [vmem:[#allocation7 + $0xb0] ss:$8 sps:$4 sm:$0xff]  }
  0x56   :  { %v843_v34 = vld [vmem:[#allocation7 + $0xc4] ss:$8 sps:$4 sm:$0xff]   ;;  %v845_v35 = vld [vmem:[#allocation7 + $0xc0] ss:$8 sps:$4 sm:$0xff]   ;;  %v846_v36 = vld [vmem:[#allocation7 + $0xd4] ss:$8 sps:$4 sm:$0xff]  }
  0x57   :  { %396 = vmatpush1.bf16.msra.mxu1 %v815_v15  ;;  %v848_v37 = vld [vmem:[#allocation7 + $0xd0] ss:$8 sps:$4 sm:$0xff]   ;;  %v849_v38 = vld [vmem:[#allocation7 + $0xe4] ss:$8 sps:$4 sm:$0xff]   ;;  %v851_v39 = vld [vmem:[#allocation7 + $0xe0] ss:$8 sps:$4 sm:$0xff]  }
  0x58   :  { %725 = vmatmul.mubr.msk.bf16.vlgmr.msra.gmra.mrb[0].mxu0 %vm138_vm0, %v89_v14  ;;  %397 = vmatprep.subr.bf16.mxu1 %v816_v16  ;;  %v852_v40 = vld [vmem:[#allocation7 + $0xf4] ss:$8 sps:$4 sm:$0xff]   ;;  %v854_v41 = vld [vmem:[#allocation7 + $0xf0] ss:$8 sps:$4 sm:$0xff]   ;;  %v855_v42 = vld [vmem:[#allocation8] ss:$8 sps:$4 sm:$0xff]  }
  0x59   :  { %v857_v43 = vld [vmem:[#allocation8 + $0x4] ss:$8 sps:$4 sm:$0xff]   ;;  %v860_v44 = vld [vmem:[#allocation8 + $0x14] ss:$8 sps:$4 sm:$0xff]   ;;  %v858_v45 = vld [vmem:[#allocation8 + $0x10] ss:$8 sps:$4 sm:$0xff]  }
  0x5a   :  { %640 = vmatprep.subr.bf16.mxu0 %v857_v43  ;;  %v863_v46 = vld [vmem:[#allocation8 + $0x24] ss:$8 sps:$4 sm:$0xff]   ;;  %v861_v47 = vld [vmem:[#allocation8 + $0x20] ss:$8 sps:$4 sm:$0xff]   ;;  %v866_v48 = vld [vmem:[#allocation8 + $0x34] ss:$8 sps:$4 sm:$0xff]  }
  0x5b   :  { %398 = vmatpush1.bf16.msra.mxu1 %v818_v17  ;;  %641 = vmatpush1.bf16.msra.mxu0 %v855_v42  ;;  %v864_v49 = vld [vmem:[#allocation8 + $0x30] ss:$8 sps:$4 sm:$0xff]   ;;  %v869_v50 = vld [vmem:[#allocation8 + $0x44] ss:$8 sps:$4 sm:$0xff]   ;;  %v867_v51 = vld [vmem:[#allocation8 + $0x40] ss:$8 sps:$4 sm:$0xff]  }
  0x5c   :  { %399 = vmatprep.subr.bf16.mxu1 %v819_v18  ;;  %642 = vmatprep.subr.bf16.mxu0 %v860_v44  ;;  %v872_v52 = vld [vmem:[#allocation8 + $0x54] ss:$8 sps:$4 sm:$0xff]   ;;  %v870_v53 = vld [vmem:[#allocation8 + $0x50] ss:$8 sps:$4 sm:$0xff]   ;;  %v875_v54 = vld [vmem:[#allocation8 + $0x64] ss:$8 sps:$4 sm:$0xff]  }
  0x5d   :  { %v873_v55 = vld [vmem:[#allocation8 + $0x60] ss:$8 sps:$4 sm:$0xff]   ;;  %v878_v56 = vld [vmem:[#allocation8 + $0x74] ss:$8 sps:$4 sm:$0xff]   ;;  %v876_v57 = vld [vmem:[#allocation8 + $0x70] ss:$8 sps:$4 sm:$0xff]  }
  0x5e   :  { %v881_v58 = vld [vmem:[#allocation8 + $0x84] ss:$8 sps:$4 sm:$0xff]   ;;  %v879_v59 = vld [vmem:[#allocation8 + $0x80] ss:$8 sps:$4 sm:$0xff]   ;;  %v884_v60 = vld [vmem:[#allocation8 + $0x94] ss:$8 sps:$4 sm:$0xff]  }
  0x5f   :  { %400 = vmatpush1.bf16.msra.mxu1 %v821_v19  ;;  %643 = vmatpush1.bf16.msra.mxu0 %v858_v45  ;;  %v882_v61 = vld [vmem:[#allocation8 + $0x90] ss:$8 sps:$4 sm:$0xff]   ;;  %v887_v62 = vld [vmem:[#allocation8 + $0xa4] ss:$8 sps:$4 sm:$0xff]   ;;  %v885_v63 = vld [vmem:[#allocation8 + $0xa0] ss:$8 sps:$4 sm:$0xff]  }
  0x60   :  { %401 = vmatprep.subr.bf16.mxu1 %v822_v20  ;;  %644 = vmatprep.subr.bf16.mxu0 %v863_v46  ;;  %v890_v0 = vld [vmem:[#allocation8 + $0xb4] ss:$8 sps:$4 sm:$0xff]   ;;  %v888_v1 = vld [vmem:[#allocation8 + $0xb0] ss:$8 sps:$4 sm:$0xff]   ;;  %v893_v2 = vld [vmem:[#allocation8 + $0xc4] ss:$8 sps:$4 sm:$0xff]  }
  0x61   :  { %v891_v3 = vld [vmem:[#allocation8 + $0xc0] ss:$8 sps:$4 sm:$0xff]   ;;  %v896_v4 = vld [vmem:[#allocation8 + $0xd4] ss:$8 sps:$4 sm:$0xff]   ;;  %v894_v5 = vld [vmem:[#allocation8 + $0xd0] ss:$8 sps:$4 sm:$0xff]  }
  0x62   :  { %v99_v7 = vshrl.u32 %v98_v6, 7  ;;  %v96_v9 = vld [vmem:[%s1131_s2] sm:$0x3] }
  0x63   :  { %402 = vmatpush1.bf16.msra.mxu1 %v824_v21  ;;  %645 = vmatpush1.bf16.msra.mxu0 %v861_v47  ;;  %v685_v44 = vld [vmem:[%s1136_s7] sm:$0x3] }
  0x64   :  { %403 = vmatprep.subr.bf16.mxu1 %v825_v22  ;;  %646 = vmatprep.subr.bf16.mxu0 %v866_v48  ;;  %v100_v8 = vsub.s32 0, %v99_v7  ;;  %v104_v10 = vsub.s32 1, %v99_v7 }
  0x66   :  { %v101_v11 = vrot.slane %v96_v9, %v100_v8  ;;  %v105_v12 = vrot.slane %v96_v9, %v104_v10 }
  0x67   :  { %404 = vmatpush1.bf16.msra.mxu1 %v827_v23  ;;  %647 = vmatpush1.bf16.msra.mxu0 %v864_v49  ;;  %v899_v23 = vld [vmem:[#allocation8 + $0xe4] ss:$8 sps:$4 sm:$0xff]  }
  0x68   :  { %405 = vmatprep.subr.bf16.mxu1 %v828_v24  ;;  %648 = vmatprep.subr.bf16.mxu0 %v869_v50  ;;  %v897_v24 = vld [vmem:[#allocation8 + $0xe0] ss:$8 sps:$4 sm:$0xff]  }
  0x6b   :  { %406 = vmatpush1.bf16.msra.mxu1 %v830_v25  ;;  %649 = vmatpush1.bf16.msra.mxu0 %v867_v51  ;;  %v902_v25 = vld [vmem:[#allocation8 + $0xf4] ss:$8 sps:$4 sm:$0xff]   ;;  %v690_v51 = vrot.slane %v685_v44, %v100_v8 }
  0x6c   :  { %407 = vmatprep.subr.bf16.mxu1 %v831_v26  ;;  %650 = vmatprep.subr.bf16.mxu0 %v872_v52  ;;  %v900_v26 = vld [vmem:[#allocation8 + $0xf0] ss:$8 sps:$4 sm:$0xff]  }
  0x6f   :  { %408 = vmatpush1.bf16.msra.mxu1 %v833_v27  ;;  %651 = vmatpush1.bf16.msra.mxu0 %v870_v53  ;;  %v219_v27 = vld [vmem:[%s1133_s4] sm:$0x3]  ;;  %v694_v53 = vrot.slane %v685_v44, %v104_v10 }
  0x70   :  { %409 = vmatprep.subr.bf16.mxu1 %v834_v28  ;;  %652 = vmatprep.subr.bf16.mxu0 %v875_v54  ;;  %v224_v28 = vrot.slane %v219_v27, %v100_v8 }
  0x73   :  { %410 = vmatpush1.bf16.msra.mxu1 %v836_v29  ;;  %653 = vmatpush1.bf16.msra.mxu0 %v873_v55  ;;  %v228_v29 = vrot.slane %v219_v27, %v104_v10 }
  0x74   :  { %411 = vmatprep.subr.bf16.mxu1 %v837_v30  ;;  %654 = vmatprep.subr.bf16.mxu0 %v878_v56 }
  0x77   :  { %412 = vmatpush1.bf16.msra.mxu1 %v839_v31  ;;  %655 = vmatpush1.bf16.msra.mxu0 %v876_v57 }
  0x78   :  { %413 = vmatprep.subr.bf16.mxu1 %v840_v32  ;;  %656 = vmatprep.subr.bf16.mxu0 %v881_v58 }
  0x7b   :  { %414 = vmatpush1.bf16.msra.mxu1 %v842_v33  ;;  %657 = vmatpush1.bf16.msra.mxu0 %v879_v59  ;;  %v790_v59 = vld [vmem:[#allocation2] ss:$0 sm:$0xff] }
  0x7c   :  { %415 = vmatprep.subr.bf16.mxu1 %v843_v34  ;;  %658 = vmatprep.subr.bf16.mxu0 %v884_v60 }
  0x7f   :  { %416 = vmatpush1.bf16.msra.mxu1 %v845_v35  ;;  %659 = vmatpush1.bf16.msra.mxu0 %v882_v61 }
  0x80   :  { %417 = vmatprep.subr.bf16.mxu1 %v846_v36  ;;  %660 = vmatprep.subr.bf16.mxu0 %v887_v62 }
  0x83   :  { %418 = vmatpush1.bf16.msra.mxu1 %v848_v37  ;;  %661 = vmatpush1.bf16.msra.mxu0 %v885_v63 }
  0x84   :  { %419 = vmatprep.subr.bf16.mxu1 %v849_v38  ;;  %662 = vmatprep.subr.bf16.mxu0 %v890_v0 }
  0x87   :  { %420 = vmatpush1.bf16.msra.mxu1 %v851_v39  ;;  %663 = vmatpush1.bf16.msra.mxu0 %v888_v1 }
  0x88   :  { %421 = vmatprep.subr.bf16.mxu1 %v852_v40  ;;  %664 = vmatprep.subr.bf16.mxu0 %v893_v2  ;;  %v468_v40 = vld [vmem:[%s1135_s6] sm:$0x3] }
  0x89   :  { %v477_v42 = vrot.slane %v468_v40, %v104_v10 }
  0x8b   :  { %422 = vmatpush1.bf16.msra.mxu1 %v854_v41  ;;  %665 = vmatpush1.bf16.msra.mxu0 %v891_v3  ;;  %v473_v41 = vrot.slane %v468_v40, %v100_v8 }
  0x8c   :  { %666 = vmatprep.subr.bf16.mxu0 %v896_v4 }
  0x8f   :  { %667 = vmatpush1.bf16.msra.mxu0 %v894_v5 }
  0x90   :  { %668 = vmatprep.subr.bf16.mxu0 %v899_v23 }
  0x93   :  { %669 = vmatpush1.bf16.msra.mxu0 %v897_v24 }
  0x94   :  { %670 = vmatprep.subr.bf16.mxu0 %v902_v25 }
  0x97   :  { %671 = vmatpush1.bf16.msra.mxu0 %v900_v26 }
 0x12b   :  { %v176_v13 = vpop.f32.mrb[0].mxu0 }
 0x12c   :  { %v177_v14 = vadd.f32 %v176_v13, %v101_v11  ;;  %v178_v15 = vpop.f32.mrb[1].mxu0 }
 0x12d   :  { %v179_v16 = vadd.f32 %v178_v15, %v105_v12  ;;  %v180_v17 = vpop.f32.mrb[2].mxu0 }
 0x12e   :  { %v183_v18 = vmax.f32 %v177_v14, 0.0  ;;  %v181_v19 = vpop.f32.mrb[3].mxu0 }
 0x12f   :  { %v184_v20 = vmax.f32 %v179_v16, 0.0 }
 0x130   :  { %v185_v22 = vpack.c.bf16 %v183_v18, %v183_v18 }
 0x131   :  { %v186_v21 = vpack.c.bf16 %v184_v20, %v184_v20 }
 0x133   :  { %423 = vmatprep.mubr.bf16.mxu1 %v186_v21 }
 0x134   :  { %424 = vmatmul.mubr.bf16.vlgmr.msra.gmra.mrb[0].mxu1 %v185_v22 }
 0x207   :  { %v425_v30 = vpop.f32.mrb[0].mxu1 }
 0x208   :  { %v426_v31 = vadd.f32 %v425_v30, %v224_v28  ;;  %v427_v32 = vpop.f32.mrb[1].mxu1 }
 0x209   :  { %v428_v33 = vadd.f32 %v427_v32, %v228_v29  ;;  %v429_v34 = vpop.f32.mrb[2].mxu1 }
 0x20a   :  { %v432_v35 = vmax.f32 %v426_v31, 0.0  ;;  %v430_v36 = vpop.f32.mrb[3].mxu1 }
 0x20b   :  { %v433_v37 = vmax.f32 %v428_v33, 0.0 }
 0x20c   :  { %v434_v39 = vpack.c.bf16 %v432_v35, %v432_v35 }
 0x20d   :  { %v435_v38 = vpack.c.bf16 %v433_v37, %v433_v37 }
 0x20f   :  { %672 = vmatprep.mubr.bf16.mxu0 %v435_v38 }
 0x210   :  { %673 = vmatmul.mubr.bf16.vlgmr.msra.gmra.mrb[4].mxu0 %v434_v39 }
 0x2e3   :  { %v674_v43 = vpop.f32.mrb[4].mxu0 }
 0x2e4   :  { %v675_v45 = vadd.f32 %v674_v43, %v473_v41  ;;  %v676_v46 = vpop.f32.mrb[5].mxu0 }
 0x2e5   :  { %v677_v47 = vadd.f32 %v676_v46, %v477_v42  ;;  %v678_v48 = vpop.f32.mrb[6].mxu0 }
 0x2e6   :  { %v681_v49 = vadd.f32 %v675_v45, %v183_v18  ;;  %v679_v50 = vpop.f32.mrb[7].mxu0 }
 0x2e7   :  { %v682_v52 = vadd.f32 %v677_v47, %v184_v20 }
 0x2e8   :  { %v683_v54 = vmax.f32 %v681_v49, 0.0 }
 0x2e9   :  { %v684_v55 = vmax.f32 %v682_v52, 0.0 }
 0x2ea   :  { %v697_v56 = vmul.f32 %v690_v51, %v683_v54 }
 0x2eb   :  { %v698_v57 = vmul.f32 %v694_v53, %v684_v55 }
 0x2ed   :  { %v699_v58 = vadd.f32 %v698_v57, %v697_v56 }
 0x2ef   :  { %700 = vadd.xlane.f32.xlu0 %v699_v58 }
 0x37c   :  { %v701_v60 = vpop.xlane.xlu0 %700 }
 0x37d   :  { %v709_v61 = vadd.f32 %v790_v59, %v701_v60 }
 0x37f   :  { %711 = vst.msk [vmem:[%s1138_s9] sm:$0xff] %vm710_vm1, %v709_v61 }
 0x380   :  { %716 = vsyncpa [#allocation4], 1 }
 0x381   :  { %717 = vsyncpa [#allocation6], 1 }
 0x382   :  { %718 = vsyncpa [#allocation9], 1 }

</bundles_post_ra>
